<compile_context>
chip_gen: v5e
topology: v5e:2x2
jax: 0.10.0
libtpu: 0.0.40
codegen_flags: <defaults>
</compile_context>

<pallas_src>
import jax
import jax.numpy as jnp
from jax.experimental import pallas as pl
from jax.experimental.pallas import tpu as pltpu

_HI = jax.lax.Precision.HIGHEST


def _mha_kernel(w_ca_ref, w_wwbd_ref, w_oebd_ref, wc_ref, ctx_ref, out_ref, attn_ref):
    """Fused MultiHeadAttention forward for one block of bt batch items.

    w_ca_ref   : (cdf, P)          conv_context folded into conv_context{K} (transposed)
    w_wwbd_ref : (bt*idf, bt*idf)  block-diag(conv_weighted), applied on the S side
    w_oebd_ref : (bt*idf, bt*idf)  block-diag(conv_out pre-summed over 8 concat blocks)
    wc_ref     : (bt, idf, P)      weightedContext block (lane-dense P)
    ctx_ref    : (bt, S, cdf)      context block, transposed (cdf on lanes)
    out_ref    : (bt, idf, P)      output, flattened spatial (lane-dense store)
    attn_ref   : (bt, idf, S)      attention in its natural compute layout
    """
    bt, S, cdf = ctx_ref.shape
    _, idf, P = wc_ref.shape

    # Shared weights: constant index map -> held resident across grid steps.
    w_ca = w_ca_ref[...]
    w_wwbd = w_wwbd_ref[...]
    w_oebd = w_oebd_ref[...]

    # (1) sourceC for the whole block in ONE well-occupied matmul:
    #     src[b*S + s, p] = sourceC_b[p, s]
    ctx_all = ctx_ref[...].reshape(bt * S, cdf)
    src_all = jnp.dot(ctx_all, w_ca,
                      preferred_element_type=jnp.float32, precision=_HI)   # (bt*S, P)
    src_b = src_all.reshape(bt, S, P)

    # (2) raw scores g[b,i,s] = sum_p wc_in[b,i,p] * src_b[b,s,p] (contract the big P dim)
    g = jax.lax.dot_general(
        wc_ref[...], src_b,
        dimension_numbers=(((2,), (2,)), ((0,), (0,))),
        preferred_element_type=jnp.float32, precision=_HI)                 # (bt, idf, S)

    # (3) conv_weighted reassociated onto the small S side (block-diag across the block)
    scores = jnp.dot(w_wwbd, g.reshape(bt * idf, S),
                     preferred_element_type=jnp.float32, precision=_HI)    # (bt*idf, S)

    # (4) one softmax over S for the whole block (exact divide: rows sum to 1)
    m = jnp.max(scores, axis=-1, keepdims=True)
    e = jnp.exp(scores - m)
    attn = e / jnp.sum(e, axis=-1, keepdims=True)                          # (bt*idf, S)
    attn_ref[...] = attn.reshape(bt, idf, S).astype(attn_ref.dtype)

    # (5) conv_out (pre-summed over the 8 identical concat blocks) on the small S side
    a2 = jnp.dot(w_oebd, attn,
                 preferred_element_type=jnp.float32,
                 precision=_HI).reshape(bt, idf, S)

    # (6) out[b,i,p] = sum_s a2[b,i,s] * src_b[b,s,p]  -- single lane-dense store
    out = jax.lax.dot_general(
        a2, src_b,
        dimension_numbers=(((2,), (1,)), ((0,), (0,))),
        preferred_element_type=jnp.float32, precision=_HI)                 # (bt, idf, P)
    out_ref[...] = out.astype(out_ref.dtype)


def _pick_bt(B, idf, cdf, P, S, budget_bytes=12 << 20):
    """Batch-block size: amortize the ~0.35us per-grid-step overhead, stay inside a VMEM
    budget safe even on v7x (64 MiB physical / 32 MiB scoped default), account for the
    shared (cdf, P) weight, and keep >= 2 grid steps so both v7x TensorCores get work."""
    fixed = 2 * 4 * cdf * P                                   # shared w_ca (buffered)
    per_item = 2 * 4 * (2 * idf * P + S * cdf + idf * S) + 4 * S * P
    avail = max(budget_bytes - fixed, per_item)
    bt = int(avail // per_item)
    bt = max(1, min(bt, 16))          # cap: bounds block-diag weights / wasted MACs
    if B >= 2:
        bt = min(bt, max(1, B // 2))  # >= 2 parallel grid steps for the two v7x TCs
    return max(1, min(bt, B))


@jax.jit
def multi_head_attention(weightedContext, context,
                         w_weighted, w_context, w_attn, w_out):
    """Fused MultiHeadAttention forward.

    weightedContext : (B, idf, P)  with idf == cdf // 8 and P == ih*iw (square spatial)
    context         : (B, cdf, S)
    w_weighted      : (idf, idf)   conv_weighted 1x1 weight (out, in), bias=False
    w_context       : (cdf, cdf)   conv_context 1x1 weight (out, in)
    w_attn          : (P, cdf)     conv_context{K} 1x1 weight selected by ih
    w_out           : (idf, cdf)   conv_out 1x1 weight (out, in)
    Returns (out (B, idf, ih, iw), attention (B, S, idf)).
    """
    B, idf, P = weightedContext.shape
    cdf, S = context.shape[1], context.shape[2]
    ih = int(round(P ** 0.5))  # TODO(synk): assumes square spatial map, as the module does

    bt = _pick_bt(B, idf, cdf, P, S)
    B_pad = ((B + bt - 1) // bt) * bt

    # Wrapper-side layout plumbing + offline weight folds (outside the hot loop).
    ctx_t = jnp.transpose(context, (0, 2, 1))                          # (B, S, cdf)
    w_ca = jnp.matmul(w_attn, w_context, precision=_HI).T              # (cdf, P)
    w_oe = w_out.reshape(idf, 8, idf).sum(axis=1)                      # (idf, idf)
    eye_bt = jnp.eye(bt, dtype=w_weighted.dtype)
    w_wwbd = jnp.kron(eye_bt, w_weighted)                              # (bt*idf, bt*idf)
    w_oebd = jnp.kron(eye_bt, w_oe)                                    # (bt*idf, bt*idf)

    wc_in = weightedContext
    if B_pad != B:                                                     # pad, don't shrink bt
        pad = B_pad - B
        wc_in = jnp.pad(wc_in, ((0, pad), (0, 0), (0, 0)))
        ctx_t = jnp.pad(ctx_t, ((0, pad), (0, 0), (0, 0)))

    # VMEM estimate -> compiler limit (shared weights + double-buffered blocks + temps).
    vmem_est = (2 * 4 * (cdf * P + 2 * (bt * idf) ** 2)
                + 2 * 4 * bt * (2 * idf * P + S * cdf + idf * S)
                + 4 * bt * (S * P + idf * P))
    vmem_limit = int(min(max(4 * vmem_est, 16 << 20), 32 << 20))

    out_flat, attn = pl.pallas_call(
        _mha_kernel,
        out_shape=(
            jax.ShapeDtypeStruct((B_pad, idf, P), jnp.float32),
            jax.ShapeDtypeStruct((B_pad, idf, S), jnp.float32),
        ),
        grid_spec=pltpu.PrefetchScalarGridSpec(
            num_scalar_prefetch=0,
            grid=(B_pad // bt,),
            in_specs=[
                pl.BlockSpec((cdf, P), lambda g: (0, 0)),              # shared weights:
                pl.BlockSpec((bt * idf, bt * idf), lambda g: (0, 0)),  # constant index map
                pl.BlockSpec((bt * idf, bt * idf), lambda g: (0, 0)),  # -> stay resident
                pl.BlockSpec((bt, idf, P), lambda g: (g, 0, 0)),
                pl.BlockSpec((bt, S, cdf), lambda g: (g, 0, 0)),
            ],
            out_specs=[
                pl.BlockSpec((bt, idf, P), lambda g: (g, 0, 0)),
                pl.BlockSpec((bt, idf, S), lambda g: (g, 0, 0)),
            ],
        ),
        compiler_params=pltpu.CompilerParams(
            dimension_semantics=("parallel",),
            vmem_limit_bytes=vmem_limit),
    )(w_ca, w_wwbd, w_oebd, wc_in, ctx_t)

    out = out_flat[:B].reshape(B, idf, ih, ih)
    attention = jnp.transpose(attn[:B], (0, 2, 1))                     # (B, S, idf)
    return out, attention


def _reference(weightedContext, context, w_weighted, w_context, w_attn, w_out):
    """Pure-JAX reference reproducing the PyTorch MultiHeadAttention.forward exactly."""
    B, idf, P = weightedContext.shape
    ih = int(round(P ** 0.5))
    wc = jnp.einsum("oi,bip->bop", w_weighted, weightedContext, precision=_HI)
    ctx = jnp.einsum("oc,bcs->bos", w_context, context, precision=_HI)
    sourceC = jnp.einsum("pc,bcs->bps", w_attn, ctx, precision=_HI)          # (B, P, S)
    scores = jnp.einsum("bip,bps->bis", wc, sourceC, precision=_HI)          # (B, idf, S)
    attn = jax.nn.softmax(scores, axis=-1)
    attn_c = jnp.transpose(attn, (0, 2, 1))                                  # (B, S, idf)
    wcc = jnp.einsum("bps,bsi->bpi", sourceC, attn_c, precision=_HI)         # (B, P, idf)
    c_code = jnp.transpose(wcc, (0, 2, 1))                                   # (B, idf, P)
    cat = jnp.concatenate([c_code] * 8, axis=1)                              # (B, 8*idf, P)
    out = jnp.einsum("oc,bcp->bop", w_out, cat,
                     precision=_HI).reshape(B, idf, ih, ih)
    return out, attn_c


if __name__ == "__main__":
    key = jax.random.PRNGKey(0)

    # Small shapes consistent with MultiHeadAttention: cdf=64 -> idf = cdf//8 = 8,
    # spatial ih=iw=16 (P=256, selects conv_context2), sourceL=8, batch=4.
    B, cdf, S, ih = 4, 64, 8, 16
    idf = cdf // 8
    P = ih * ih

    keys = jax.random.split(key, 6)
    k_wc, k_ctx, k1, k2, k3, k4 = keys

    weightedContext = 0.5 * jax.random.normal(k_wc, (B, idf, P), dtype=jnp.float32)
    context = jax.random.normal(k_ctx, (B, cdf, S), dtype=jnp.float32)

    # Deterministic 1x1-conv weights, stored as (out_channels, in_channels); bias=False.
    w_weighted = (1.0 / jnp.sqrt(idf)) * jax.random.normal(k1, (idf, idf), dtype=jnp.float32)
    w_context = (1.0 / jnp.sqrt(cdf)) * jax.random.normal(k2, (cdf, cdf), dtype=jnp.float32)
    w_out = (1.0 / jnp.sqrt(cdf)) * jax.random.normal(k4, (idf, cdf), dtype=jnp.float32)
    # All six conv_context{0..5} weights (as in the module); forward selects by ih.
    conv_ctx_keys = jax.random.split(k3, 6)
    conv_context_weights = {
        r: (1.0 / jnp.sqrt(cdf)) * jax.random.normal(conv_ctx_keys[i], (r * r, cdf),
                                                     dtype=jnp.float32)
        for i, r in enumerate((4, 8, 16, 32, 64, 128))
    }
    w_attn = conv_context_weights[ih]                      # conv_context2 for ih == 16

    out, attn = multi_head_attention(weightedContext, context,
                                     w_weighted, w_context, w_attn, w_out)
    out = jax.block_until_ready(out)
    attn = jax.block_until_ready(attn)

    ref_out, ref_attn = _reference(weightedContext, context,
                                   w_weighted, w_context, w_attn, w_out)

    assert out.shape == (B, idf, ih, ih)
    assert attn.shape == (B, S, idf)
    assert jnp.allclose(attn, ref_attn, atol=2e-3, rtol=2e-3)
    assert jnp.allclose(out, ref_out, atol=2e-3, rtol=2e-3)

    print("KERNEL_OK")
</pallas_src>

<mosaic_0001>
module attributes {stable_mosaic.version = 11 : i64} {
  func.func @_mha_kernel(%arg0: i32, %arg1: memref<64x256xf32, #tpu.memory_space<vmem>>, %arg2: memref<16x16xf32, #tpu.memory_space<vmem>>, %arg3: memref<16x16xf32, #tpu.memory_space<vmem>>, %arg4: memref<2x8x256xf32, #tpu.memory_space<vmem>>, %arg5: memref<2x8x64xf32, #tpu.memory_space<vmem>>, %arg6: memref<2x8x256xf32, #tpu.memory_space<vmem>>, %arg7: memref<2x8x8xf32, #tpu.memory_space<vmem>>) attributes {dimension_semantics = [#tpu.dimension_semantics<parallel>], iteration_bounds = array<i64: 2>, scalar_prefetch = 0 : i64, scratch_operands = 0 : i64, tpu.core_type = #tpu.core_type<tc>, window_params = [{pipeline_mode = #tpu.pipeline_mode<synchronous>, transform_indices = @transform_0, window_bounds = array<i64: 64, 256>}, {pipeline_mode = #tpu.pipeline_mode<synchronous>, transform_indices = @transform_1, window_bounds = array<i64: 16, 16>}, {pipeline_mode = #tpu.pipeline_mode<synchronous>, transform_indices = @transform_2, window_bounds = array<i64: 16, 16>}, {transform_indices = @transform_3, window_bounds = array<i64: 2, 8, 256>}, {transform_indices = @transform_4, window_bounds = array<i64: 2, 8, 64>}, {transform_indices = @transform_5, window_bounds = array<i64: 2, 8, 256>}, {transform_indices = @transform_6, window_bounds = array<i64: 2, 8, 8>}]} {
    %c0 = arith.constant 0 : index
    %c0_0 = arith.constant 0 : index
    %0 = vector.load %arg1[%c0, %c0_0] : memref<64x256xf32, #tpu.memory_space<vmem>>, vector<64x256xf32>
    %c0_1 = arith.constant 0 : index
    %c0_2 = arith.constant 0 : index
    %1 = vector.load %arg2[%c0_1, %c0_2] : memref<16x16xf32, #tpu.memory_space<vmem>>, vector<16x16xf32>
    %c0_3 = arith.constant 0 : index
    %c0_4 = arith.constant 0 : index
    %2 = vector.load %arg3[%c0_3, %c0_4] : memref<16x16xf32, #tpu.memory_space<vmem>>, vector<16x16xf32>
    %c0_5 = arith.constant 0 : index
    %c0_6 = arith.constant 0 : index
    %c0_7 = arith.constant 0 : index
    %3 = vector.load %arg5[%c0_5, %c0_6, %c0_7] : memref<2x8x64xf32, #tpu.memory_space<vmem>>, vector<2x8x64xf32>
    %4 = vector.shape_cast %3 : vector<2x8x64xf32> to vector<16x64xf32>
    %cst = arith.constant dense<0.000000e+00> : vector<16x256xf32>
    %5 = tpu.matmul %4, %0, %cst {dimension_numbers = #tpu.dot_dimension_numbers<[1], [0], [0], [1], [0, 0, 1, 1], [], []>, precision = #tpu.contract_precision<fp32>} : vector<16x64xf32>, vector<64x256xf32>, vector<16x256xf32> -> vector<16x256xf32>
    %6 = vector.shape_cast %5 : vector<16x256xf32> to vector<2x8x256xf32>
    %c0_8 = arith.constant 0 : index
    %c0_9 = arith.constant 0 : index
    %c0_10 = arith.constant 0 : index
    %7 = vector.load %arg4[%c0_8, %c0_9, %c0_10] : memref<2x8x256xf32, #tpu.memory_space<vmem>>, vector<2x8x256xf32>
    %cst_11 = arith.constant dense<0.000000e+00> : vector<2x8x8xf32>
    %8 = tpu.matmul %7, %6, %cst_11 {dimension_numbers = #tpu.dot_dimension_numbers<[2], [2], [1], [1], [0, 0, 0, 1, 1, 1], [0], [0]>, precision = #tpu.contract_precision<fp32>} : vector<2x8x256xf32>, vector<2x8x256xf32>, vector<2x8x8xf32> -> vector<2x8x8xf32>
    %9 = vector.shape_cast %8 : vector<2x8x8xf32> to vector<16x8xf32>
    %cst_12 = arith.constant dense<0.000000e+00> : vector<16x8xf32>
    %10 = tpu.matmul %1, %9, %cst_12 {dimension_numbers = #tpu.dot_dimension_numbers<[1], [0], [0], [1], [0, 0, 1, 1], [], []>, precision = #tpu.contract_precision<fp32>} : vector<16x16xf32>, vector<16x8xf32>, vector<16x8xf32> -> vector<16x8xf32>
    %cst_13 = arith.constant dense<0xFF800000> : vector<16xf32>
    %11 = vector.multi_reduction <maximumf>, %10, %cst_13 [1] : vector<16x8xf32> to vector<16xf32>
    %12 = vector.shape_cast %11 : vector<16xf32> to vector<16x1xf32>
    %13 = vector.broadcast %12 : vector<16x1xf32> to vector<16x8xf32>
    %14 = arith.subf %10, %13 : vector<16x8xf32>
    %15 = math.exp %14 : vector<16x8xf32>
    %cst_14 = arith.constant dense<0.000000e+00> : vector<16xf32>
    %16 = vector.multi_reduction <add>, %15, %cst_14 [1] : vector<16x8xf32> to vector<16xf32>
    %17 = vector.shape_cast %16 : vector<16xf32> to vector<16x1xf32>
    %18 = vector.broadcast %17 : vector<16x1xf32> to vector<16x8xf32>
    %19 = arith.divf %15, %18 : vector<16x8xf32>
    %20 = vector.shape_cast %19 : vector<16x8xf32> to vector<2x8x8xf32>
    %c0_15 = arith.constant 0 : index
    %c0_16 = arith.constant 0 : index
    %c0_17 = arith.constant 0 : index
    %21 = vector.load %arg7[%c0_15, %c0_16, %c0_17] : memref<2x8x8xf32, #tpu.memory_space<vmem>>, vector<2x8x8xf32>
    tpu.vector_store %arg7[%c0_15, %c0_16, %c0_17], %20 {strides = array<i32>} : memref<2x8x8xf32, #tpu.memory_space<vmem>>, vector<2x8x8xf32>,
    %cst_18 = arith.constant dense<0.000000e+00> : vector<16x8xf32>
    %22 = tpu.matmul %2, %19, %cst_18 {dimension_numbers = #tpu.dot_dimension_numbers<[1], [0], [0], [1], [0, 0, 1, 1], [], []>, precision = #tpu.contract_precision<fp32>} : vector<16x16xf32>, vector<16x8xf32>, vector<16x8xf32> -> vector<16x8xf32>
    %23 = vector.shape_cast %22 : vector<16x8xf32> to vector<2x8x8xf32>
    %cst_19 = arith.constant dense<0.000000e+00> : vector<2x8x256xf32>
    %24 = tpu.matmul %23, %6, %cst_19 {dimension_numbers = #tpu.dot_dimension_numbers<[2], [1], [1], [2], [0, 0, 0, 1, 1, 2], [0], [0]>, precision = #tpu.contract_precision<fp32>} : vector<2x8x8xf32>, vector<2x8x256xf32>, vector<2x8x256xf32> -> vector<2x8x256xf32>
    %c0_20 = arith.constant 0 : index
    %c0_21 = arith.constant 0 : index
    %c0_22 = arith.constant 0 : index
    %25 = vector.load %arg6[%c0_20, %c0_21, %c0_22] : memref<2x8x256xf32, #tpu.memory_space<vmem>>, vector<2x8x256xf32>
    tpu.vector_store %arg6[%c0_20, %c0_21, %c0_22], %24 {strides = array<i32>} : memref<2x8x256xf32, #tpu.memory_space<vmem>>, vector<2x8x256xf32>,
    return
  }
  func.func @transform_0(%arg0: i32) -> (i32, i32) {
    %c0_i32 = arith.constant 0 : i32
    %c0_i32_0 = arith.constant 0 : i32
    %c0_i32_1 = arith.constant 0 : i32
    return %c0_i32, %c0_i32_0 : i32, i32
  }
  func.func @transform_1(%arg0: i32) -> (i32, i32) {
    %c0_i32 = arith.constant 0 : i32
    %c0_i32_0 = arith.constant 0 : i32
    %c0_i32_1 = arith.constant 0 : i32
    return %c0_i32, %c0_i32_0 : i32, i32
  }
  func.func @transform_2(%arg0: i32) -> (i32, i32) {
    %c0_i32 = arith.constant 0 : i32
    %c0_i32_0 = arith.constant 0 : i32
    %c0_i32_1 = arith.constant 0 : i32
    return %c0_i32, %c0_i32_0 : i32, i32
  }
  func.func @transform_3(%arg0: i32) -> (i32, i32, i32) {
    %c0_i32 = arith.constant 0 : i32
    %c0_i32_0 = arith.constant 0 : i32
    %c0_i32_1 = arith.constant 0 : i32
    return %arg0, %c0_i32, %c0_i32_0 : i32, i32, i32
  }
  func.func @transform_4(%arg0: i32) -> (i32, i32, i32) {
    %c0_i32 = arith.constant 0 : i32
    %c0_i32_0 = arith.constant 0 : i32
    %c0_i32_1 = arith.constant 0 : i32
    return %arg0, %c0_i32, %c0_i32_0 : i32, i32, i32
  }
  func.func @transform_5(%arg0: i32) -> (i32, i32, i32) {
    %c0_i32 = arith.constant 0 : i32
    %c0_i32_0 = arith.constant 0 : i32
    %c0_i32_1 = arith.constant 0 : i32
    return %arg0, %c0_i32, %c0_i32_0 : i32, i32, i32
  }
  func.func @transform_6(%arg0: i32) -> (i32, i32, i32) {
    %c0_i32 = arith.constant 0 : i32
    %c0_i32_0 = arith.constant 0 : i32
    %c0_i32_1 = arith.constant 0 : i32
    return %arg0, %c0_i32, %c0_i32_0 : i32, i32, i32
  }
}

</mosaic_0001>

<bundles_post_ra>
// kernel: multi_head_attention.1
= control target key start
LH: loop header
LB: loop body
LE: loop exit
PB: predicated region body
PF: predicated region fallthrough
CT: control target
= control target key end

     0   :  { %s2669_s21 = smov 0   ;;  %s3198_s0 = inlined_call_operand.vmem [shape: f32[64,256], index: 0, kind: input, shape index: {}]   ;;  %s3199_s1 = inlined_call_operand.vmem [shape: f32[16,16], index: 1, kind: input, shape index: {}]   ;;  %s3200_s2 = inlined_call_operand.vmem [shape: f32[16,16], index: 2, kind: input, shape index: {}]   ;;  %s3201_s3 = inlined_call_operand.vmem [shape: f32[4,8,256], index: 3, kind: input, shape index: {}]   ;;  %s3202_s4 = inlined_call_operand.vmem [shape: f32[4,8,64], index: 4, kind: input, shape index: {}]   ;;  %s3203_s5 = inlined_call_operand.vmem [shape: f32[4,8,256], index: 5, kind: output, shape index: {0}]   ;;  %s3204_s6 = inlined_call_operand.vmem [shape: f32[4,8,8], index: 6, kind: output, shape index: {1}]  }
   0x1 LB: > { %s2591_s22 = sadd.s32 4294967295, %s2632_s21   ;;  %p2595_p0 = scmp.ge.s32.totalorder %s2632_s21, 1  ;;  %s2632_s21 = sphi %s2669_s21, %s17_s21  }
   0x2   : > { %p228_p1 = scmp.lt.s32.totalorder %s2632_s21, 3 }
   0x4   : > { %p229_p2 = pnand %p2595_p0, %p228_p1 }
   0x5   : > { %s2596_s29 = sshll.u32 (!%p229_p2), %s2591_s22, 1 }
   0x6   : > { %232 = sbr.rel (%p229_p2) target bundleno = 1172 (0x494), region = 40  ;;  %p271_p3 = scmp.lt.s32.totalorder (!%p229_p2), %s2596_s29, 3 }
   0xb   : > { %v310_v0 = vld [vmem:[%s3198_s0 + $0x70] sm:$0xff]  ;;  %v308_v1 = vld [vmem:[%s3198_s0 + $0x60] sm:$0xff]  ;;  %s3206_s29 = smov (!%p271_p3, %s2596_s29), 3  ;;  %v311_v25 = vld [vmem:[%s3198_s0 + $0x78] sm:$0xff]  ;;  %vm318_vm0 = vcmask 523264   ;;  %vm1449_vm1 = vcmask 130048  }
   0xc   : > { %v306_v2 = vld [vmem:[%s3198_s0 + $0x50] sm:$0xff]  ;;  %v2686_v3 = vand.u32 4294901760, %v310_v0  ;;  %v2688_v4 = vand.u32 4294901760, %v308_v1  ;;  %v304_v6 = vld [vmem:[%s3198_s0 + $0x40] sm:$0xff]  ;;  %s2600_s18 = sshll.u32 %s3206_s29, 3  ;;  %v2775_v35 = vand.u32 4294901760, %v311_v25 }
   0xd   : > { %v2690_v5 = vand.u32 4294901760, %v306_v2  ;;  %v302_v7 = vld [vmem:[%s3198_s0 + $0x30] sm:$0xff]  ;;  %v300_v8 = vld [vmem:[%s3198_s0 + $0x20] sm:$0xff]  ;;  %v2701_v9 = vand.u32 4294901760, %v304_v6  ;;  %s281_s22 = scalar_lea.vmem %s3202_s4, %s2600_s18  ;;  %v309_v36 = vld [vmem:[%s3198_s0 + $0x68] sm:$0xff]  ;;  %s2608_s14 = sshll.u32 %s3206_s29, 4 }
   0xe   : > { %v2703_v10 = vand.u32 4294901760, %v302_v7  ;;  %v2705_v11 = vand.u32 4294901760, %v300_v8  ;;  %v298_v12 = vld [vmem:[%s3198_s0 + $0x10] sm:$0xff]  ;;  %v296_v13 = vld [vmem:[%s3198_s0] sm:$0xff]  ;;  %334 = vmatpush.msra.mxu0 %v2686_v3  ;;  %v2715_v14 = vsub.f32 %v310_v0, %v2686_v3  ;;  %483 = vmatpush.msra.mxu3 %v2686_v3  ;;  %v2719_v15 = vsub.f32 %v308_v1, %v2688_v4  ;;  %v317_v41 = vld [vmem:[%s281_s22 + $0x8] sm:$0xff]  ;;  %s3029_s17 = scalar_lea.vmem %s3201_s3, %s2608_s14  ;;  %s294_s7 = scalar_lea.vmem %s3204_s6, %s2600_s18 }
   0xf   : > { %v2722_v16 = vsub.f32 %v306_v2, %v2690_v5  ;;  %v2724_v17 = vand.u32 4294901760, %v298_v12  ;;  %v2727_v18 = vsub.f32 %v304_v6, %v2701_v9  ;;  %v2735_v21 = vand.u32 4294901760, %v296_v13  ;;  %v316_v33 = vld [vmem:[%s281_s22] sm:$0xff]  ;;  %v307_v42 = vld [vmem:[%s3198_s0 + $0x58] sm:$0xff]  ;;  %v305_v43 = vld [vmem:[%s3198_s0 + $0x48] sm:$0xff]  ;;  %s3189_s9 = scalar_lea.vmem %s3203_s5, %s2608_s14 }
  0x10   : > { %v2730_v19 = vsub.f32 %v302_v7, %v2703_v10  ;;  %v2733_v20 = vsub.f32 %v300_v8, %v2705_v11  ;;  %336 = vmatpush.msra.mxu0 %v2688_v4  ;;  %441 = vmatpush.msra.mxu2 %v2715_v14  ;;  %v376_v22 = vand.u32 4294901760, %v2715_v14  ;;  %v382_v23 = vand.u32 4294901760, %v2719_v15  ;;  %v303_v55 = vld [vmem:[%s3198_s0 + $0x38] sm:$0xff]  ;;  %v301_v0 = vld [vmem:[%s3198_s0 + $0x28] sm:$0xff] }
  0x11   : > { %v388_v24 = vand.u32 4294901760, %v2722_v16  ;;  %485 = vmatpush.msra.mxu3 %v2688_v4  ;;  %v394_v26 = vand.u32 4294901760, %v2727_v18  ;;  %v2752_v28 = vsub.f32 %v298_v12, %v2724_v17  ;;  %v2773_v34 = vsub.f32 %v296_v13, %v2735_v21 }
  0x12   : > { %v400_v27 = vand.u32 4294901760, %v2730_v19  ;;  %338 = vmatpush.msra.mxu0 %v2690_v5  ;;  %444 = vmatpush.msra.mxu2 %v2719_v15  ;;  %v377_v29 = vsub.f32 %v2715_v14, %v376_v22  ;;  %v383_v30 = vsub.f32 %v2719_v15, %v382_v23  ;;  %v406_v32 = vand.u32 4294901760, %v2733_v20 }
  0x13   : > { %v389_v31 = vsub.f32 %v2722_v16, %v388_v24  ;;  %487 = vmatpush.msra.mxu3 %v2690_v5  ;;  %v395_v39 = vsub.f32 %v2727_v18, %v394_v26  ;;  %v320_v40 = vsel %vm318_vm0, %v316_v33, 0  ;;  %v412_v46 = vand.u32 4294901760, %v2752_v28 }
  0x14   : > { %340 = vmatpush.msra.mxu0 %v2701_v9  ;;  %v378_v37 = vand.u32 4294901760, %v377_v29  ;;  %447 = vmatpush.msra.mxu2 %v2722_v16  ;;  %v384_v38 = vand.u32 4294901760, %v383_v30  ;;  %v2793_v44 = vand.u32 4294901760, %v320_v40  ;;  %v401_v45 = vsub.f32 %v2730_v19, %v400_v27 }
  0x15   : > { %489 = vmatpush.msra.mxu3 %v2701_v9  ;;  %v390_v47 = vand.u32 4294901760, %v389_v31  ;;  %v407_v48 = vsub.f32 %v2733_v20, %v406_v32  ;;  %v2804_v49 = vsub.f32 %v311_v25, %v2775_v35  ;;  %v2806_v50 = vand.u32 4294901760, %v309_v36  ;;  %v299_v25 = vld [vmem:[%s3198_s0 + $0x18] sm:$0xff] }
  0x16   : > { %379 = vmatpush.msra.mxu1 %v378_v37  ;;  %342 = vmatpush.msra.mxu0 %v2703_v10  ;;  %v2811_v51 = vsub.f32 %v320_v40, %v2793_v44  ;;  %v323_v52 = vsel %vm318_vm0, %v317_v41, 0  ;;  %v2814_v53 = vand.u32 4294901760, %v307_v42  ;;  %v2816_v54 = vand.u32 4294901760, %v305_v43  ;;  %v297_v40 = vld [vmem:[%s3198_s0 + $0x8] sm:$0xff] }
  0x17   : > { %450 = vmatpush.msra.mxu2 %v2727_v18  ;;  %491 = vmatpush.msra.mxu3 %v2703_v10  ;;  %v396_v56 = vand.u32 4294901760, %v395_v39  ;;  %v644_v57 = vand.u32 4294901760, %v2804_v49  ;;  %v418_v58 = vand.u32 4294901760, %v2773_v34  ;;  %v2825_v59 = vsub.f32 %v309_v36, %v2806_v50 }
  0x18   : > { %385 = vmatpush.msra.mxu1 %v384_v38  ;;  %344 = vmatpush.msra.mxu0 %v2705_v11  ;;  %v2830_v60 = vand.u32 4294901760, %v2811_v51  ;;  %v402_v61 = vand.u32 4294901760, %v401_v45  ;;  %v2832_v62 = vand.u32 4294901760, %v323_v52  ;;  %v2835_v63 = vsub.f32 %v307_v42, %v2814_v53 }
  0x19   : > { %453 = vmatpush.msra.mxu2 %v2730_v19  ;;  %493 = vmatpush.msra.mxu3 %v2705_v11  ;;  %v413_v1 = vsub.f32 %v2752_v28, %v412_v46  ;;  %v650_v2 = vand.u32 4294901760, %v2825_v59  ;;  %v2846_v6 = vsub.f32 %v305_v43, %v2816_v54  ;;  %v2848_v7 = vand.u32 4294901760, %v303_v55 }
  0x1a   : > { %391 = vmatpush.msra.mxu1 %v390_v47  ;;  %346 = vmatpush.msra.mxu0 %v2724_v17  ;;  %v352_v8 = vsub.f32 %v2811_v51, %v2830_v60  ;;  %v645_v12 = vsub.f32 %v2804_v49, %v644_v57  ;;  %v2858_v13 = vsub.f32 %v323_v52, %v2832_v62  ;;  %v408_v29 = vand.u32 4294901760, %v407_v48 }
  0x1b   : > { %456 = vmatpush.msra.mxu2 %v2733_v20  ;;  %495 = vmatpush.msra.mxu3 %v2724_v17  ;;  %v419_v30 = vsub.f32 %v2773_v34, %v418_v58  ;;  %v656_v31 = vand.u32 4294901760, %v2835_v63  ;;  %v2868_v33 = vand.u32 4294901760, %v301_v0  ;;  %v651_v37 = vsub.f32 %v2825_v59, %v650_v2 }
  0x1c   : > { %397 = vmatpush.msra.mxu1 %v396_v56  ;;  %348 = vmatpush.msra.mxu0 %v2735_v21  ;;  %v2870_v36 = vand.u32 4294901760, %v352_v8  ;;  %v2879_v38 = vand.u32 4294901760, %v2858_v13  ;;  %v2882_v39 = vsub.f32 %v303_v55, %v2848_v7  ;;  %v414_v41 = vand.u32 4294901760, %v413_v1 }
  0x1d   : > { %459 = vmatpush.msra.mxu2 %v2752_v28  ;;  %497 = vmatpush.msra.mxu3 %v2735_v21  ;;  %v662_v14 = vand.u32 4294901760, %v2846_v6  ;;  %v646_v42 = vand.u32 4294901760, %v645_v12  ;;  %v2896_v45 = vsub.f32 %v301_v0, %v2868_v33  ;;  %v420_v47 = vand.u32 4294901760, %v419_v30 }
  0x1e   : > { %522 = vmatpush.msrb.mxu0 %v376_v22  ;;  %403 = vmatpush.msra.mxu1 %v402_v61  ;;  %v2889_v22 = vand.u32 4294901760, %v299_v25  ;;  %v360_v43 = vsub.f32 %v2858_v13, %v2879_v38  ;;  %v657_v48 = vsub.f32 %v2835_v63, %v656_v31  ;;  %v2902_v52 = vand.u32 4294901760, %v297_v40 }
  0x1f   : > { %354 = vmatmul.f32.vlgmr.msra.gmra.mxu0 %v2870_v36  ;;  %462 = vmatpush.msra.mxu2 %v2773_v34  ;;  %v652_v55 = vand.u32 4294901760, %v651_v37  ;;  %v668_v56 = vand.u32 4294901760, %v2882_v39  ;;  %v663_v61 = vsub.f32 %v2846_v6, %v662_v14  ;;  %v674_v15 = vand.u32 4294901760, %v2896_v45 }
  0x20   : > { %409 = vmatpush.msra.mxu1 %v408_v29  ;;  %465 = vmatmul.f32.vlgmr.msra.gmra.mxu2 %v2811_v51  ;;  %v2913_v0 = vsub.f32 %v299_v25, %v2889_v22  ;;  %v2917_v1 = vand.u32 4294901760, %v360_v43  ;;  %v2922_v8 = vsub.f32 %v297_v40, %v2902_v52  ;;  %vm1646_vm2 = vcmask 64512  }
  0x21   : > { %501 = vmatmul.f32.vlgmr.msra.gmra.mxu3 %v2830_v60  ;;  %526 = vmatpush.msrb.mxu0 %v382_v23  ;;  %v658_v23 = vand.u32 4294901760, %v657_v48  ;;  %v669_v12 = vsub.f32 %v2882_v39, %v668_v56  ;;  %v664_v16 = vand.u32 4294901760, %v663_v61  ;;  %v675_v25 = vsub.f32 %v2896_v45, %v674_v15 }
  0x22   : > { %415 = vmatpush.msra.mxu1 %v414_v41  ;;  %602 = vmatpush.msrb.mxu2 %v2775_v35  ;;  %v686_v18 = vand.u32 4294901760, %v2922_v8 }
  0x23   : > { %647 = vmatpush.msrb.mxu3 %v646_v42  ;;  %530 = vmatpush.msrb.mxu0 %v388_v24  ;;  %v680_v24 = vand.u32 4294901760, %v2913_v0  ;;  %v676_v19 = vand.u32 4294901760, %v675_v25 }
  0x24   : > { %421 = vmatpush.msra.mxu1 %v420_v47  ;;  %604 = vmatpush.msrb.mxu2 %v2806_v50 }
  0x25   : > { %653 = vmatpush.msrb.mxu3 %v652_v55  ;;  %423 = vmatmul.f32.vlgmr.msra.gmra.mxu1 %v2793_v44 }
  0x26   : > { %534 = vmatpush.msrb.mxu0 %v394_v26  ;;  %569 = vmatpush.msrb.mxu1 %v2686_v3  ;;  %v670_v3 = vand.u32 4294901760, %v669_v12  ;;  %v681_v26 = vsub.f32 %v2913_v0, %v680_v24 }
  0x27   : > { %362 = vmatmul.f32.gmra.mxu0 %v2917_v1  ;;  %606 = vmatpush.msrb.mxu2 %v2814_v53 }
  0x28   : > { %659 = vmatpush.msrb.mxu3 %v658_v23  ;;  %538 = vmatpush.msrb.mxu0 %v400_v27  ;;  %v682_v27 = vand.u32 4294901760, %v681_v26 }
  0x29   : > { %571 = vmatpush.msrb.mxu1 %v2688_v4  ;;  %608 = vmatpush.msrb.mxu2 %v2816_v54  ;;  %v687_v4 = vsub.f32 %v2922_v8, %v686_v18 }
  0x2a   : > { %665 = vmatpush.msrb.mxu3 %v664_v16  ;;  %470 = vmatmul.f32.gmra.mxu2 %v2858_v13 }
  0x2b   : > { %507 = vmatmul.f32.gmra.mxu3 %v2879_v38  ;;  %542 = vmatpush.msrb.mxu0 %v406_v32 }
  0x2c   : > { %573 = vmatpush.msrb.mxu1 %v2690_v5  ;;  %610 = vmatpush.msrb.mxu2 %v2848_v7  ;;  %v688_v5 = vand.u32 4294901760, %v687_v4 }
  0x2d   : > { %671 = vmatpush.msrb.mxu3 %v670_v3  ;;  %546 = vmatpush.msrb.mxu0 %v412_v46 }
  0x2e   : > { %575 = vmatpush.msrb.mxu1 %v2701_v9  ;;  %612 = vmatpush.msrb.mxu2 %v2868_v33 }
  0x2f   : > { %677 = vmatpush.msrb.mxu3 %v676_v19  ;;  %427 = vmatmul.f32.gmra.mxu1 %v2832_v62 }
  0x30   : > { %550 = vmatpush.msrb.mxu0 %v418_v58  ;;  %577 = vmatpush.msrb.mxu1 %v2703_v10 }
  0x31   : > { %552 = vmatmul.f32.vlgmr.msrb.gmra.mxu0 %v2793_v44  ;;  %614 = vmatpush.msrb.mxu2 %v2889_v22 }
  0x32   : > { %683 = vmatpush.msrb.mxu3 %v682_v27  ;;  %709 = vmatpush.msra.mxu0 %v2804_v49 }
  0x33   : > { %579 = vmatpush.msrb.mxu1 %v2705_v11  ;;  %616 = vmatpush.msrb.mxu2 %v2902_v52 }
  0x34   : > { %689 = vmatpush.msrb.mxu3 %v688_v5  ;;  %622 = vmatmul.f32.vlgmr.msrb.gmra.mxu2 %v2870_v36 }
  0x35   : > { %691 = vmatmul.f32.vlgmr.msrb.gmra.mxu3 %v2793_v44  ;;  %712 = vmatpush.msra.mxu0 %v2825_v59 }
  0x36   : > { %581 = vmatpush.msrb.mxu1 %v2724_v17  ;;  %790 = vmatpush.msra.mxu2 %v644_v57 }
  0x37   : > { %715 = vmatpush.msra.mxu0 %v2835_v63  ;;  %837 = vmatpush.msra.mxu3 %v2775_v35 }
  0x38   : > { %583 = vmatpush.msrb.mxu1 %v2735_v21  ;;  %794 = vmatpush.msra.mxu2 %v650_v2  ;;  %v861_v21 = vld [vmem:[%s3029_s17] sm:$0xff] }
  0x39   : > { %585 = vmatmul.f32.vlgmr.msrb.gmra.mxu1 %v2793_v44  ;;  %718 = vmatpush.msra.mxu0 %v2846_v6  ;;  %v3032_v28 = vand.u32 4294901760, %v861_v21 }
  0x3a   : > { %556 = vmatmul.f32.gmra.mxu0 %v2832_v62  ;;  %751 = vmatpush.msra.mxu1 %v2775_v35 }
  0x3b   : > { %798 = vmatpush.msra.mxu2 %v656_v31  ;;  %839 = vmatpush.msra.mxu3 %v2806_v50  ;;  %v883_v46 = vsub.f32 %v861_v21, %v3032_v28 }
  0x3c   : > { %721 = vmatpush.msra.mxu0 %v2882_v39  ;;  %753 = vmatpush.msra.mxu1 %v2806_v50 }
  0x3d   : > { %802 = vmatpush.msra.mxu2 %v662_v14  ;;  %841 = vmatpush.msra.mxu3 %v2814_v53 }
  0x3e   : > { %630 = vmatmul.f32.gmra.mxu2 %v2917_v1  ;;  %695 = vmatmul.f32.gmra.mxu3 %v2832_v62 }
  0x3f   : > { %724 = vmatpush.msra.mxu0 %v2896_v45  ;;  %755 = vmatpush.msra.mxu1 %v2814_v53 }
  0x40   : > { %806 = vmatpush.msra.mxu2 %v668_v56  ;;  %843 = vmatpush.msra.mxu3 %v2816_v54  ;;  %v863_v56 = vld [vmem:[%s3029_s17 + $0x10] sm:$0xff] }
  0x41   : > { %727 = vmatpush.msra.mxu0 %v2913_v0  ;;  %757 = vmatpush.msra.mxu1 %v2816_v54  ;;  %v3068_v23 = vand.u32 4294901760, %v863_v56 }
  0x42   : > { %810 = vmatpush.msra.mxu2 %v674_v15  ;;  %845 = vmatpush.msra.mxu3 %v2848_v7 }
  0x43   : > { %589 = vmatmul.f32.gmra.mxu1 %v2832_v62  ;;  %730 = vmatpush.msra.mxu0 %v2922_v8  ;;  %v1175_v19 = vsub.f32 %v863_v56, %v3068_v23 }
  0x44   : > { %733 = vmatmul.f32.vlgmr.msra.gmra.mxu0 %v2811_v51  ;;  %759 = vmatpush.msra.mxu1 %v2848_v7  ;;  %v884_v51 = vand.u32 4294901760, %v883_v46 }
  0x45   : > { %814 = vmatpush.msra.mxu2 %v680_v24  ;;  %847 = vmatpush.msra.mxu3 %v2868_v33 }
  0x46   : > { %761 = vmatpush.msra.mxu1 %v2868_v33  ;;  %v885_v59 = vsub.f32 %v883_v46, %v884_v51  ;;  %v862_v33 = vld [vmem:[%s3029_s17 + $0x8] sm:$0xff] }
  0x47   : > { %818 = vmatpush.msra.mxu2 %v686_v18  ;;  %849 = vmatpush.msra.mxu3 %v2889_v22  ;;  %v3052_v14 = vand.u32 4294901760, %v862_v33 }
  0x48   : > { %820 = vmatmul.f32.vlgmr.msra.gmra.mxu2 %v2793_v44  ;;  %763 = vmatpush.msra.mxu1 %v2889_v22  ;;  %v886_v7 = vand.u32 4294901760, %v885_v59 }
  0x49   : > { %851 = vmatpush.msra.mxu3 %v2902_v52  ;;  %v1029_v48 = vsub.f32 %v862_v33, %v3052_v14 }
  0x4a   : > { %853 = vmatmul.f32.vlgmr.msra.gmra.mxu3 %v2793_v44  ;;  %765 = vmatpush.msra.mxu1 %v2902_v52 }
  0x4b   : > { %769 = vmatmul.f32.vlgmr.msra.gmra.mxu1 %v2830_v60  ;;  %v1030_v1 = vand.u32 4294901760, %v1029_v48 }
  0x4c   : > { %738 = vmatmul.f32.gmra.mxu0 %v2858_v13 }
  0x4d   : > { %v1031_v18 = vsub.f32 %v1029_v48, %v1030_v1 }
  0x50   : > { %824 = vmatmul.f32.gmra.mxu2 %v2832_v62 }
  0x52   : > { %857 = vmatmul.f32.gmra.mxu3 %v2832_v62 }
  0x53   : > { %775 = vmatmul.f32.gmra.mxu1 %v2879_v38 }
  0x9c   : > { %v355_v9 = vpop.f32.mrf.mxu0 }
  0xa2   : > { %v424_v10 = vpop.f32.mrf.mxu1 }
  0xa3   : > { %v466_v11 = vpop.f32.mrf.mxu2  ;;  %v425_v32 = vadd.f32 %v424_v10, %v355_v9  ;;  %v1032_v10 = vand.u32 4294901760, %v1031_v18 }
  0xa4   : > { %v363_v17 = vpop.f32.mrf.mxu0  ;;  %v502_v20 = vpop.f32.mrf.mxu3 }
  0xa5   : > { %v467_v49 = vadd.f32 %v466_v11, %v425_v32 }
  0xa7   : > { %v503_v53 = vadd.f32 %v502_v20, %v467_v49  ;;  %v1176_v20 = vand.u32 4294901760, %v1175_v19 }
  0xac   : > { %v428_v34 = vpop.f32.mrf.mxu1 }
  0xad   : > { %v471_v35 = vpop.f32.mrf.mxu2  ;;  %v429_v54 = vadd.f32 %v428_v34, %v363_v17 }
  0xae   : > { %v553_v44 = vpop.f32.mrf.mxu0  ;;  %v508_v50 = vpop.f32.mrf.mxu3 }
  0xaf   : > { %v554_v57 = vadd.f32 %v553_v44, %v503_v53  ;;  %v472_v2 = vadd.f32 %v471_v35, %v429_v54  ;;  %v864_v44 = vld [vmem:[%s3029_s17 + $0x18] sm:$0xff] }
  0xb1   : > { %v509_v30 = vadd.f32 %v508_v50, %v472_v2 }
  0xb6   : > { %v586_v58 = vpop.f32.mrf.mxu1 }
  0xb7   : > { %v587_v60 = vadd.f32 %v586_v58, %v554_v57  ;;  %v623_v62 = vpop.f32.mrf.mxu2  ;;  %v557_v63 = vpop.f32.mrf.mxu0 }
  0xb8   : > { %v692_v29 = vpop.f32.mrf.mxu3  ;;  %v558_v36 = vadd.f32 %v557_v63, %v509_v30 }
  0xb9   : > { %v3035_v6 = vand.u32 4294901760, %v587_v60  ;;  %v693_v43 = vadd.f32 %v692_v29, %v623_v62 }
  0xbb   : > { %v3038_v13 = vsub.f32 %v587_v60, %v3035_v6  ;;  %881 = vmatpush.xpose.msrb.mxu0 %v3035_v6  ;;  %957 = vmatpush.xpose.msrb.mxu3 %v3035_v6 }
  0xbd   : > { %934 = vmatpush.xpose.msrb.mxu2 %v3038_v13  ;;  %v3044_v31 = vand.u32 4294901760, %v3038_v13 }
  0xbe   : > { %887 = vmatmul.f32.vlgmr.msrb.gmra.mxu0 %v886_v7  ;;  %961 = vmatmul.f32.vlgmr.msrb.gmra.mxu3 %v884_v51  ;;  %v1320_v51 = vand.u32 4294901760, %v864_v44 }
  0xbf   : > { %983 = vmatpush.xpose.msra.mxu0 %v3044_v31  ;;  %v909_v37 = vsub.f32 %v3038_v13, %v3044_v31 }
  0xc0   : > { %v590_v38 = vpop.f32.mrf.mxu1  ;;  %937 = vmatmul.f32.vlgmr.msrb.gmra.mxu2 %v883_v46  ;;  %v1177_v46 = vsub.f32 %v1175_v19, %v1176_v20  ;;  %v1321_v58 = vsub.f32 %v864_v44, %v1320_v51 }
  0xc1   : > { %v591_v39 = vadd.f32 %v590_v38, %v558_v36  ;;  %v631_v40 = vpop.f32.mrf.mxu2  ;;  %v3050_v41 = vand.u32 4294901760, %v909_v37  ;;  %v734_v22 = vpop.f32.mrf.mxu0 }
  0xc2   : > { %v696_v47 = vpop.f32.mrf.mxu3  ;;  %v735_v52 = vadd.f32 %v734_v22, %v693_v43  ;;  %v1178_v54 = vand.u32 4294901760, %v1177_v46  ;;  %v1322_v60 = vand.u32 4294901760, %v1321_v58 }
  0xc3   : > { %v3054_v42 = vand.u32 4294901760, %v591_v39  ;;  %911 = vmatpush.xpose.msrb.mxu1 %v3050_v41  ;;  %v697_v16 = vadd.f32 %v696_v47, %v631_v40 }
  0xc4   : > { %v1323_v63 = vsub.f32 %v1321_v58, %v1322_v60 }
  0xc5   : > { %v3059_v45 = vsub.f32 %v591_v39, %v3054_v42 }
  0xc6   : > { %913 = vmatmul.f32.vlgmr.msrb.gmra.mxu1 %v3032_v28  ;;  %985 = vmatmul.f32.vlgmr.msra.gmra.mxu0 %v3032_v28  ;;  %v1324_v2 = vand.u32 4294901760, %v1323_v63 }
  0xc7   : > { %1005 = vmatpush.xpose.msra.mxu1 %v3035_v6  ;;  %v3066_v61 = vand.u32 4294901760, %v3059_v45 }
  0xc8   : > { %v770_v55 = vpop.f32.mrf.mxu1 }
  0xc9   : > { %v771_v0 = vadd.f32 %v770_v55, %v735_v52  ;;  %v739_v8 = vpop.f32.mrf.mxu0  ;;  %v1201_v25 = vsub.f32 %v3059_v45, %v3066_v61 }
  0xca   : > { %v740_v26 = vadd.f32 %v739_v8, %v697_v16 }
  0xcb   : > { %v821_v15 = vpop.f32.mrf.mxu2  ;;  %v3076_v9 = vand.u32 4294901760, %v1201_v25  ;;  %v312_v25 = vld [vmem:[%s3199_s1] sm:$0xff] }
  0xcc   : > { %v822_v12 = vadd.f32 %v821_v15, %v771_v0 }
  0xcd   : > { %v854_v24 = vpop.f32.mrf.mxu3 }
  0xce   : > { %v855_v3 = vadd.f32 %v854_v24, %v822_v12  ;;  %1007 = vmatmul.f32.vlgmr.msra.gmra.mxu1 %v3032_v28 }
  0xd0   : > { %v3074_v4 = vand.u32 4294901760, %v855_v3  ;;  %v776_v27 = vpop.f32.mrf.mxu1 }
  0xd1   : > { %v777_v5 = vadd.f32 %v776_v27, %v740_v26 }
  0xd2   : > { %v3079_v11 = vsub.f32 %v855_v3, %v3074_v4  ;;  %1027 = vmatpush.xpose.msra.mxu2 %v3074_v4  ;;  %1103 = vmatpush.xpose.msrb.mxu1 %v3074_v4 }
  0xd3   : > { %v825_v17 = vpop.f32.mrf.mxu2 }
  0xd4   : > { %v826_v21 = vadd.f32 %v825_v17, %v777_v5  ;;  %1080 = vmatpush.xpose.msrb.mxu0 %v3079_v11  ;;  %v3086_v28 = vand.u32 4294901760, %v3079_v11  ;;  %v1451_v5 = vsel %vm1449_vm1, %v312_v25, 0 }
  0xd5   : > { %v858_v32 = vpop.f32.mrf.mxu3  ;;  %1033 = vmatmul.f32.vlgmr.msra.gmra.mxu2 %v1032_v10 }
  0xd6   : > { %1203 = vmatpush.xpose.msra.mxu1 %v3076_v9  ;;  %v859_v34 = vadd.f32 %v858_v32, %v826_v21  ;;  %1129 = vmatpush.xpose.msrb.mxu2 %v3086_v28  ;;  %v1055_v35 = vsub.f32 %v3079_v11, %v3086_v28 }
  0xd7   : > { %1107 = vmatmul.f32.vlgmr.msrb.gmra.mxu1 %v1030_v1  ;;  %1083 = vmatmul.f32.vlgmr.msrb.gmra.mxu0 %v1029_v48 }
  0xd8   : > { %1173 = vmatpush.xpose.msra.mxu0 %v3054_v42  ;;  %v3094_v49 = vand.u32 4294901760, %v859_v34  ;;  %v3098_v50 = vand.u32 4294901760, %v1055_v35 }
  0xda   : > { %1226 = vmatpush.xpose.msra.mxu2 %v3059_v45  ;;  %1297 = vmatpush.xpose.msrb.mxu1 %v3054_v42  ;;  %v3101_v53 = vsub.f32 %v859_v34, %v3094_v49  ;;  %v313_v34 = vld [vmem:[%s3199_s1 + $0x8] sm:$0xff] }
  0xdb   : > { %1057 = vmatpush.xpose.msra.mxu3 %v3098_v50 }
  0xdc   : > { %1275 = vmatpush.xpose.msrb.mxu0 %v3066_v61  ;;  %v3106_v57 = vand.u32 4294901760, %v3101_v53 }
  0xdd   : > { %1131 = vmatmul.f32.vlgmr.msrb.gmra.mxu2 %v3052_v14 }
  0xde   : > { %1059 = vmatmul.f32.vlgmr.msra.gmra.mxu3 %v3052_v14  ;;  %1319 = vmatpush.xpose.msrb.mxu2 %v3094_v49  ;;  %v1347_v59 = vsub.f32 %v3101_v53, %v3106_v57 }
  0xdf   : > { %1151 = vmatpush.xpose.msrb.mxu3 %v3074_v4  ;;  %1179 = vmatmul.f32.vlgmr.msra.gmra.mxu0 %v1178_v54 }
  0xe0   : > { %1205 = vmatmul.f32.vlgmr.msra.gmra.mxu1 %v3068_v23  ;;  %1372 = vmatpush.xpose.msra.mxu0 %v3101_v53  ;;  %v3117_v62 = vand.u32 4294901760, %v1347_v59  ;;  %v1454_v59 = vsel %vm1449_vm1, %v313_v34, 0 }
  0xe1   : > { %1395 = vmatpush.xpose.msra.mxu1 %v3094_v49 }
  0xe3   : > { %1249 = vmatpush.xpose.msra.mxu3 %v3054_v42 }
  0xe5   : > { %1229 = vmatmul.f32.vlgmr.msra.gmra.mxu2 %v1175_v19 }
  0xe6   : > { %1153 = vmatmul.f32.vlgmr.msrb.gmra.mxu3 %v3052_v14  ;;  %1421 = vmatpush.xpose.msra.mxu2 %v3106_v57 }
  0xe7   : > { %1349 = vmatpush.xpose.msrb.mxu3 %v3117_v62  ;;  %1277 = vmatmul.f32.vlgmr.msrb.gmra.mxu0 %v3068_v23 }
  0xe8   : > { %1299 = vmatmul.f32.vlgmr.msrb.gmra.mxu1 %v3068_v23 }
  0xed   : > { %1325 = vmatmul.f32.vlgmr.msrb.gmra.mxu2 %v1324_v2 }
  0xee   : > { %1253 = vmatmul.f32.vlgmr.msra.gmra.mxu3 %v1176_v20  ;;  %v1474_v20 = vand.u32 4294901760, %v1451_v5 }
  0xef   : > { %1443 = vmatpush.xpose.msra.mxu3 %v3094_v49  ;;  %1375 = vmatmul.f32.vlgmr.msra.gmra.mxu0 %v1321_v58 }
  0xf0   : > { %1399 = vmatmul.f32.vlgmr.msra.gmra.mxu1 %v1322_v60 }
  0xf5   : > { %1423 = vmatmul.f32.vlgmr.msra.gmra.mxu2 %v1320_v51 }
  0xf6   : > { %1351 = vmatmul.f32.vlgmr.msrb.gmra.mxu3 %v1320_v51 }
  0xfe   : > { %1445 = vmatmul.f32.vlgmr.msra.gmra.mxu3 %v1320_v51  ;;  %v1475_v51 = vsub.f32 %v1451_v5, %v1474_v20 }
 0x13b   : > { %v888_v7 = vpop.f32.mrf.mxu0 }
 0x141   : > { %v962_v39 = vpop.f32.mrf.mxu3 }
 0x143   : > { %v914_v29 = vpop.f32.mrf.mxu1  ;;  %v938_v30 = vpop.f32.mrf.mxu2 }
 0x144   : > { %v986_v33 = vpop.f32.mrf.mxu0  ;;  %v915_v36 = vadd.f32 %v914_v29, %v888_v7  ;;  %v1476_v7 = vand.u32 4294901760, %v1475_v51  ;;  %v1482_v29 = vand.u32 4294901760, %v1454_v59 }
 0x146   : > { %v939_v38 = vadd.f32 %v938_v30, %v915_v36 }
 0x148   : > { %v963_v22 = vadd.f32 %v962_v39, %v939_v38  ;;  %v1477_v38 = vsub.f32 %v1475_v51, %v1476_v7  ;;  %v1483_v39 = vsub.f32 %v1454_v59, %v1482_v29 }
 0x14a   : > { %v987_v47 = vadd.f32 %v986_v33, %v963_v22 }
 0x14b   : > { %v1008_v37 = vpop.f32.mrf.mxu1 }
 0x14c   : > { %v1009_v55 = vadd.f32 %v1008_v37, %v987_v47  ;;  %v1484_v47 = vand.u32 4294901760, %v1483_v39 }
 0x154   : > { %v1084_v14 = vpop.f32.mrf.mxu0  ;;  %v1108_v43 = vpop.f32.mrf.mxu1 }
 0x158   : > { %v1034_v40 = vpop.f32.mrf.mxu2 }
 0x159   : > { %v1035_v0 = vadd.f32 %v1034_v40, %v1009_v55 }
 0x15c   : > { %v1180_v56 = vpop.f32.mrf.mxu0 }
 0x15d   : > { %v1206_v15 = vpop.f32.mrf.mxu1 }
 0x15e   : > { %v1207_v12 = vadd.f32 %v1206_v15, %v1180_v56  ;;  %v1485_v56 = vsub.f32 %v1483_v39, %v1484_v47 }
 0x160   : > { %v1132_v52 = vpop.f32.mrf.mxu2 }
 0x161   : > { %v1060_v48 = vpop.f32.mrf.mxu3 }
 0x162   : > { %v1061_v23 = vadd.f32 %v1060_v48, %v1035_v0 }
 0x164   : > { %v1085_v16 = vadd.f32 %v1084_v14, %v1061_v23  ;;  %v1278_v24 = vpop.f32.mrf.mxu0  ;;  %v1486_v23 = vand.u32 4294901760, %v1485_v56 }
 0x165   : > { %v1300_v26 = vpop.f32.mrf.mxu1 }
 0x166   : > { %v1109_v19 = vadd.f32 %v1108_v43, %v1085_v16  ;;  %v1478_v43 = vand.u32 4294901760, %v1477_v38 }
 0x168   : > { %v1230_v8 = vpop.f32.mrf.mxu2  ;;  %v1133_v21 = vadd.f32 %v1132_v52, %v1109_v19 }
 0x169   : > { %v1154_v1 = vpop.f32.mrf.mxu3  ;;  %v1231_v18 = vadd.f32 %v1230_v8, %v1207_v12 }
 0x16a   : > { %v1155_v54 = vadd.f32 %v1154_v1, %v1133_v21 }
 0x16c   : > { %v1376_v46 = vpop.f32.mrf.mxu0  ;;  %v1472_v30 = vand.u32 4294901760, %v1155_v54 }
 0x16d   : > { %v1400_v60 = vpop.f32.mrf.mxu1 }
 0x16e   : > { %v1512_v40 = vsub.f32 %v1155_v54, %v1472_v30 }
 0x170   : > { %v1326_v10 = vpop.f32.mrf.mxu2  ;;  %v1513_v52 = vand.u32 4294901760, %v1512_v40 }
 0x171   : > { %v1254_v3 = vpop.f32.mrf.mxu3 }
 0x172   : > { %v1255_v27 = vadd.f32 %v1254_v3, %v1231_v18  ;;  %v1514_v1 = vsub.f32 %v1512_v40, %v1513_v52 }
 0x174   : > { %v1279_v17 = vadd.f32 %v1278_v24, %v1255_v27  ;;  %v1515_v8 = vand.u32 4294901760, %v1514_v1 }
 0x176   : > { %v1301_v32 = vadd.f32 %v1300_v26, %v1279_v17 }
 0x178   : > { %v1327_v35 = vadd.f32 %v1326_v10, %v1301_v32  ;;  %v1424_v2 = vpop.f32.mrf.mxu2 }
 0x179   : > { %v1352_v44 = vpop.f32.mrf.mxu3 }
 0x17a   : > { %v1353_v58 = vadd.f32 %v1352_v44, %v1327_v35 }
 0x17c   : > { %v1377_v63 = vadd.f32 %v1376_v46, %v1353_v58 }
 0x17e   : > { %v1401_v33 = vadd.f32 %v1400_v60, %v1377_v63 }
 0x180   : > { %v1425_v36 = vadd.f32 %v1424_v2, %v1401_v33 }
 0x181   : > { %v1446_v37 = vpop.f32.mrf.mxu3 }
 0x182   : > { %v1447_v14 = vadd.f32 %v1446_v37, %v1425_v36 }
 0x184   : > { %v1470_v22 = vand.u32 4294901760, %v1447_v14 }
 0x186   : > { %v1506_v48 = vsub.f32 %v1447_v14, %v1470_v22  ;;  %1471 = vmatpush.msrb.mxu0 %v1470_v22  ;;  %1572 = vmatpush.msrb.mxu3 %v1470_v22  ;;  %v314_v14 = vld [vmem:[%s3200_s2] sm:$0xff] }
 0x188   : > { %v1507_v55 = vand.u32 4294901760, %v1506_v48  ;;  %1473 = vmatpush.msrb.mxu0 %v1472_v30  ;;  %1542 = vmatpush.msrb.mxu2 %v1506_v48 }
 0x189   : > { %1574 = vmatpush.msrb.mxu3 %v1472_v30  ;;  %1479 = vmatmul.f32.vlgmr.msrb.gmra.mxu0 %v1478_v43 }
 0x18a   : > { %v1508_v0 = vsub.f32 %v1506_v48, %v1507_v55  ;;  %1545 = vmatpush.msrb.mxu2 %v1512_v40  ;;  %1605 = vmatpush.msra.mxu0 %v1507_v55  ;;  %v1698_v48 = vsel %vm1449_vm1, %v314_v14, 0 }
 0x18b   : > { %1548 = vmatmul.f32.vlgmr.msrb.gmra.mxu2 %v1475_v51  ;;  %1578 = vmatmul.f32.vlgmr.msrb.gmra.mxu3 %v1476_v7  ;;  %v3141_v56 = vand.u32 4294901760, %v1698_v48 }
 0x18c   : > { %1609 = vmatpush.msra.mxu0 %v1513_v52  ;;  %v1509_v15 = vand.u32 4294901760, %v1508_v0 }
 0x18e   : > { %1510 = vmatpush.msrb.mxu1 %v1509_v15  ;;  %v315_v15 = vld [vmem:[%s3200_s2 + $0x8] sm:$0xff] }
 0x190   : > { %1516 = vmatpush.msrb.mxu1 %v1515_v8 }
 0x191   : > { %1487 = vmatmul.f32.gmra.mxu0 %v1486_v23  ;;  %1518 = vmatmul.f32.vlgmr.msrb.gmra.mxu1 %v1474_v20 }
 0x192   : > { %1634 = vmatpush.msra.mxu1 %v1470_v22 }
 0x193   : > { %1553 = vmatmul.f32.gmra.mxu2 %v1483_v39  ;;  %1584 = vmatmul.f32.gmra.mxu3 %v1484_v47 }
 0x194   : > { %1636 = vmatpush.msra.mxu1 %v1472_v30 }
 0x199   : > { %1522 = vmatmul.f32.gmra.mxu1 %v1482_v29  ;;  %1611 = vmatmul.f32.vlgmr.msra.gmra.mxu0 %v1474_v20 }
 0x1a1   : > { %1615 = vmatmul.f32.gmra.mxu0 %v1482_v29  ;;  %1638 = vmatmul.f32.vlgmr.msra.gmra.mxu1 %v1474_v20 }
 0x1a9   : > { %1642 = vmatmul.f32.gmra.mxu1 %v1482_v29 }
 0x206   : > { %v1480_v12 = vpop.f32.mrf.mxu0 }
 0x20e   : > { %v1488_v16 = vpop.f32.mrf.mxu0  ;;  %v1519_v24 = vpop.f32.mrf.mxu1 }
 0x20f   : > { %v1549_v25 = vpop.f32.mrf.mxu2  ;;  %v1579_v18 = vpop.f32.mrf.mxu3  ;;  %v1520_v21 = vadd.f32 %v1519_v24, %v1480_v12 }
 0x211   : > { %v1550_v35 = vadd.f32 %v1549_v25, %v1520_v21 }
 0x213   : > { %v1580_v51 = vadd.f32 %v1579_v18, %v1550_v35  ;;  %v1701_v18 = vsel %vm1449_vm1, %v315_v15, 0 }
 0x216   : > { %v1523_v3 = vpop.f32.mrf.mxu1  ;;  %v1612_v26 = vpop.f32.mrf.mxu0 }
 0x217   : > { %v1524_v19 = vadd.f32 %v1523_v3, %v1488_v16  ;;  %v1554_v27 = vpop.f32.mrf.mxu2  ;;  %v1585_v17 = vpop.f32.mrf.mxu3  ;;  %v1613_v58 = vadd.f32 %v1612_v26, %v1580_v51  ;;  %v1722_v16 = vsub.f32 %v1698_v48, %v3141_v56 }
 0x219   : > { %v1555_v10 = vadd.f32 %v1554_v27, %v1524_v19 }
 0x21b   : > { %v1586_v34 = vadd.f32 %v1585_v17, %v1555_v10  ;;  %v1729_v10 = vand.u32 4294901760, %v1701_v18 }
 0x21e   : > { %v1639_v5 = vpop.f32.mrf.mxu1  ;;  %v1616_v32 = vpop.f32.mrf.mxu0 }
 0x21f   : > { %v1617_v44 = vadd.f32 %v1616_v32, %v1586_v34  ;;  %v1640_v59 = vadd.f32 %v1639_v5, %v1613_v58  ;;  %v1723_v5 = vand.u32 4294901760, %v1722_v16 }
 0x221   : > { %v1647_v60 = vsel %vm1646_vm2, %v1640_v59, -inf }
 0x226   : > { %v1643_v46 = vpop.f32.mrf.mxu1 }
 0x227   : > { %v1644_v20 = vadd.f32 %v1643_v46, %v1617_v44  ;;  %v1724_v46 = vsub.f32 %v1722_v16, %v1723_v5 }
 0x229   : > { %v1650_v54 = vsel %vm1646_vm2, %v1644_v20, -inf }
 0x22a   : > { %1651 = vmax.xlane.f32.xlu0 %v1650_v54 }
 0x232   : > { %1648 = vmax.xlane.f32.xlu0 %v1647_v60 }
 0x29d   : > { %v1652_v63 = vpop.xlane.xlu0 %1651 }
 0x29e   : > { %v1654_v2 = vsub.f32 %v1644_v20, %v1652_v63  ;;  %v1730_v20 = vsub.f32 %v1701_v18, %v1729_v10  ;;  %v1725_v63 = vand.u32 4294901760, %v1724_v46 }
 0x2a0   : > { %v1657_v7 = vmul.f32 1.442695, %v1654_v2  ;;  %v1731_v2 = vand.u32 4294901760, %v1730_v20 }
 0x2a2   : > { %2618 = vpow2.f32 %v1657_v7 }
 0x2a5   : > { %v1649_v29 = vpop.xlane.xlu0 %1648 }
 0x2a6   : > { %v1653_v30 = vsub.f32 %v1640_v59, %v1649_v29 }
 0x2a8   : > { %v2619_v33 = vpop.eup %2618  ;;  %v1655_v36 = vmul.f32 1.442695, %v1653_v30 }
 0x2a9   : > { %v1662_v37 = vsel %vm1646_vm2, %v2619_v33, 0.0 }
 0x2aa   : > { %2620 = vpow2.f32 %v1655_v36  ;;  %1663 = vadd.xlane.f32.xlu1 %v1662_v37 }
 0x2b0   : > { %v2621_v38 = vpop.eup %2620 }
 0x2b1   : > { %v1659_v39 = vsel %vm1646_vm2, %v2621_v38, 0.0 }
 0x2b2   : > { %1660 = vadd.xlane.f32.xlu1 %v1659_v39 }
 0x31d   : > { %v1664_v40 = vpop.xlane.xlu1 %1663 }
 0x31e   : > { %2622 = vrcp.f32 %v1664_v40  ;;  %v1691_v55 = vand.u32 2147483648, %v1664_v40  ;;  %v1689_v1 = vand.u32 2147483647, %v1664_v40  ;;  %vm1685_vm4 = vweird.f32 %v1664_v40 }
 0x320   : > { %v1692_v12 = vor.u32 1.1754944e-38, %v1691_v55  ;;  %vm1690_vm6 = vcmp.eq.f32.partialorder %v1689_v1, 8.507059e+37 }
 0x324   : > { %v2623_v22 = vpop.eup %2622 }
 0x325   : > { %v1681_v43 = vmul.f32 %v2623_v22, %v1664_v40  ;;  %v1661_v47 = vpop.xlane.xlu1 %1660  ;;  %vm1686_vm3 = vweird.f32 %v2623_v22 }
 0x326   : > { %2624 = vrcp.f32 %v1661_v47  ;;  %vm1687_vm5 = vmor %vm1685_vm4, %vm1686_vm3  ;;  %v1676_v27 = vand.u32 2147483648, %v1661_v47  ;;  %v1674_v21 = vand.u32 2147483647, %v1661_v47  ;;  %vm1670_vm8 = vweird.f32 %v1661_v47 }
 0x327   : > { %v1682_v52 = vsub.f32 1.0, %v1681_v43 }
 0x328   : > { %v1677_v44 = vor.u32 1.1754944e-38, %v1676_v27  ;;  %vm1675_vm10 = vcmp.eq.f32.partialorder %v1674_v21, 8.507059e+37 }
 0x329   : > { %v1683_v0 = vmul.f32 %v2623_v22, %v1682_v52 }
 0x32b   : > { %v1684_v23 = vadd.f32 %v2623_v22, %v1683_v0 }
 0x32c   : > { %v2625_v8 = vpop.eup %2624 }
 0x32d   : > { %v1688_v24 = vsel %vm1687_vm5, %v2623_v22, %v1684_v23  ;;  %v1666_v25 = vmul.f32 %v2625_v8, %v1661_v47  ;;  %vm1671_vm7 = vweird.f32 %v2625_v8 }
 0x32e   : > { %v1693_v3 = vsel %vm1690_vm6, %v1692_v12, %v1688_v24  ;;  %vm1672_vm9 = vmor %vm1670_vm8, %vm1671_vm7 }
 0x32f   : > { %v1667_v26 = vsub.f32 1.0, %v1666_v25  ;;  %v1694_v19 = vmul.f32 %v2619_v33, %v1693_v3  ;;  %v1732_v33 = vsub.f32 %v1730_v20, %v1731_v2 }
 0x331   : > { %v1668_v17 = vmul.f32 %v2625_v8, %v1667_v26  ;;  %v1717_v32 = vand.u32 4294901760, %v1694_v19  ;;  %1696 = vst.msk [vmem:[%s294_s7 + $0x8] sm:$0xff] %vm1646_vm2, %v1694_v19 }
 0x333   : > { %v1669_v34 = vadd.f32 %v2625_v8, %v1668_v17  ;;  %1718 = vmatpush.msra.mxu2 %v1717_v32  ;;  %1819 = vmatpush.msrb.mxu1 %v1717_v32  ;;  %v1753_v35 = vsub.f32 %v1694_v19, %v1717_v32 }
 0x335   : > { %v1673_v51 = vsel %vm1672_vm9, %v2625_v8, %v1669_v34  ;;  %1789 = vmatpush.msrb.mxu0 %v1753_v35  ;;  %v1754_v54 = vand.u32 4294901760, %v1753_v35 }
 0x336   : > { %v1678_v58 = vsel %vm1675_vm10, %v1677_v44, %v1673_v51 }
 0x337   : > { %v1679_v59 = vmul.f32 %v2621_v38, %v1678_v58  ;;  %v1755_v60 = vsub.f32 %v1753_v35, %v1754_v54  ;;  %v1733_v38 = vand.u32 4294901760, %v1732_v33 }
 0x339   : > { %1695 = vst.msk [vmem:[%s294_s7] sm:$0xff] %vm1646_vm2, %v1679_v59  ;;  %v1719_v7 = vand.u32 4294901760, %v1679_v59  ;;  %v1756_v29 = vand.u32 4294901760, %v1755_v60 }
 0x33b   : > { %1720 = vmatpush.msra.mxu2 %v1719_v7  ;;  %1757 = vmatpush.msra.mxu3 %v1756_v29  ;;  %v1759_v30 = vsub.f32 %v1679_v59, %v1719_v7 }
 0x33c   : > { %1821 = vmatpush.msrb.mxu1 %v1719_v7  ;;  %1726 = vmatmul.f32.vlgmr.msra.gmra.mxu2 %v1725_v63 }
 0x33d   : > { %1852 = vmatpush.msrb.mxu2 %v1754_v54  ;;  %v1760_v36 = vand.u32 4294901760, %v1759_v30  ;;  %1792 = vmatpush.msrb.mxu0 %v1759_v30 }
 0x33e   : > { %1942 = vmatpush.msra.mxu1 %v3050_v41  ;;  %1795 = vmatmul.f32.vlgmr.msrb.gmra.mxu0 %v1722_v16 }
 0x33f   : > { %1825 = vmatmul.f32.vlgmr.msrb.gmra.mxu1 %v1723_v5  ;;  %1912 = vmatpush.msra.mxu0 %v3035_v6  ;;  %v1761_v37 = vsub.f32 %v1759_v30, %v1760_v36 }
 0x340   : > { %2036 = vmatpush.msrb.mxu1 %v3035_v6  ;;  %1856 = vmatpush.msrb.mxu2 %v1760_v36 }
 0x341   : > { %2014 = vmatpush.msrb.mxu0 %v3044_v31  ;;  %v1762_v39 = vand.u32 4294901760, %v1761_v37 }
 0x342   : > { %1965 = vmatpush.msra.mxu2 %v3038_v13 }
 0x343   : > { %1763 = vmatpush.msra.mxu3 %v1762_v39 }
 0x344   : > { %1734 = vmatmul.f32.gmra.mxu2 %v1733_v38  ;;  %1765 = vmatmul.f32.vlgmr.msra.gmra.mxu3 %v3141_v56 }
 0x345   : > { %1881 = vmatpush.msrb.mxu3 %v1717_v32 }
 0x346   : > { %1800 = vmatmul.f32.gmra.mxu0 %v1730_v20 }
 0x347   : > { %1831 = vmatmul.f32.gmra.mxu1 %v1731_v2  ;;  %1883 = vmatpush.msrb.mxu3 %v1719_v7 }
 0x349   : > { %1988 = vmatpush.msra.mxu3 %v3035_v6 }
 0x34c   : > { %1769 = vmatmul.f32.gmra.mxu3 %v1729_v10  ;;  %1858 = vmatmul.f32.vlgmr.msrb.gmra.mxu2 %v3141_v56 }
 0x34d   : > { %2058 = vmatpush.msrb.mxu2 %v3074_v4 }
 0x354   : > { %1885 = vmatmul.f32.vlgmr.msrb.gmra.mxu3 %v3141_v56  ;;  %1862 = vmatmul.f32.gmra.mxu2 %v1729_v10 }
 0x355   : > { %2088 = vmatpush.msrb.mxu3 %v3098_v50 }
 0x35c   : > { %1889 = vmatmul.f32.gmra.mxu3 %v1729_v10 }
 0x3bb   : > { %v1796_v14 = vpop.f32.mrf.mxu0 }
 0x3bc   : > { %v1826_v6 = vpop.f32.mrf.mxu1 }
 0x3bf   : > { %v1727_v13 = vpop.f32.mrf.mxu2 }
 0x3c3   : > { %v1801_v15 = vpop.f32.mrf.mxu0 }
 0x3c4   : > { %v1832_v12 = vpop.f32.mrf.mxu1 }
 0x3c7   : > { %v1766_v31 = vpop.f32.mrf.mxu3  ;;  %v1735_v41 = vpop.f32.mrf.mxu2 }
 0x3c8   : > { %v1767_v40 = vadd.f32 %v1766_v31, %v1727_v13 }
 0x3ca   : > { %v1797_v43 = vadd.f32 %v1796_v14, %v1767_v40 }
 0x3cc   : > { %v1827_v48 = vadd.f32 %v1826_v6, %v1797_v43 }
 0x3cf   : > { %v1770_v22 = vpop.f32.mrf.mxu3  ;;  %v1859_v47 = vpop.f32.mrf.mxu2 }
 0x3d0   : > { %v1860_v52 = vadd.f32 %v1859_v47, %v1827_v48  ;;  %v1771_v0 = vadd.f32 %v1770_v22, %v1735_v41 }
 0x3d2   : > { %v1802_v50 = vadd.f32 %v1801_v15, %v1771_v0 }
 0x3d4   : > { %v1833_v25 = vadd.f32 %v1832_v12, %v1802_v50 }
 0x3d7   : > { %v1886_v55 = vpop.f32.mrf.mxu3  ;;  %v1863_v16 = vpop.f32.mrf.mxu2 }
 0x3d8   : > { %v1887_v1 = vadd.f32 %v1886_v55, %v1860_v52  ;;  %v1864_v26 = vadd.f32 %v1863_v16, %v1833_v25 }
 0x3da   : > { %v1894_v56 = vsel %vm1646_vm2, %v1887_v1, 0 }
 0x3db   : > { %v1913_v23 = vand.u32 4294901760, %v1894_v56 }
 0x3dd   : > { %v1914_v8 = vsub.f32 %v1894_v56, %v1913_v23  ;;  %1944 = vmatmul.f32.vlgmr.msra.gmra.mxu1 %v1913_v23 }
 0x3de   : > { %2134 = vmatpush.msra.mxu1 %v3074_v4 }
 0x3df   : > { %1968 = vmatmul.f32.vlgmr.msra.gmra.mxu2 %v1914_v8  ;;  %v1915_v24 = vand.u32 4294901760, %v1914_v8  ;;  %v1890_v18 = vpop.f32.mrf.mxu3 }
 0x3e0   : > { %2160 = vmatpush.msra.mxu2 %v3086_v28  ;;  %v1891_v27 = vadd.f32 %v1890_v18, %v1864_v26 }
 0x3e1   : > { %1992 = vmatmul.f32.vlgmr.msra.gmra.mxu3 %v1915_v24  ;;  %v1916_v3 = vsub.f32 %v1914_v8, %v1915_v24 }
 0x3e2   : > { %2182 = vmatpush.msra.mxu3 %v3074_v4  ;;  %v2189_v5 = vsel %vm1646_vm2, %v1891_v27, 0 }
 0x3e3   : > { %v1917_v19 = vand.u32 4294901760, %v1916_v3  ;;  %v2208_v28 = vand.u32 4294901760, %v2189_v5 }
 0x3e5   : > { %1918 = vmatmul.f32.vlgmr.msra.gmra.mxu0 %v1917_v19  ;;  %2038 = vmatmul.f32.vlgmr.msrb.gmra.mxu1 %v1913_v23  ;;  %v2209_v4 = vsub.f32 %v2189_v5, %v2208_v28 }
 0x3e6   : > { %2111 = vmatpush.msra.mxu0 %v3079_v11  ;;  %2237 = vmatpush.msrb.mxu1 %v3076_v9 }
 0x3e7   : > { %2064 = vmatmul.f32.vlgmr.msrb.gmra.mxu2 %v1917_v19  ;;  %v2210_v9 = vand.u32 4294901760, %v2209_v4 }
 0x3e8   : > { %2260 = vmatpush.msrb.mxu2 %v3059_v45 }
 0x3e9   : > { %2090 = vmatmul.f32.vlgmr.msrb.gmra.mxu3 %v1913_v23  ;;  %v2211_v45 = vsub.f32 %v2209_v4, %v2210_v9 }
 0x3ea   : > { %2283 = vmatpush.msrb.mxu3 %v3054_v42 }
 0x3ed   : > { %2016 = vmatmul.f32.vlgmr.msrb.gmra.mxu0 %v1913_v23  ;;  %2138 = vmatmul.f32.vlgmr.msra.gmra.mxu1 %v1915_v24 }
 0x3ee   : > { %2207 = vmatpush.msrb.mxu0 %v3054_v42  ;;  %2331 = vmatpush.msra.mxu1 %v3054_v42  ;;  %v2212_v42 = vand.u32 4294901760, %v2211_v45 }
 0x3ef   : > { %2162 = vmatmul.f32.vlgmr.msra.gmra.mxu2 %v1913_v23 }
 0x3f0   : > { %2353 = vmatpush.msra.mxu2 %v3094_v49 }
 0x3f1   : > { %2184 = vmatmul.f32.vlgmr.msra.gmra.mxu3 %v1913_v23 }
 0x3f2   : > { %2383 = vmatpush.msra.mxu3 %v3117_v62 }
 0x3f5   : > { %2114 = vmatmul.f32.vlgmr.msra.gmra.mxu0 %v1914_v8  ;;  %2239 = vmatmul.f32.vlgmr.msrb.gmra.mxu1 %v2208_v28 }
 0x3f6   : > { %2309 = vmatpush.msra.mxu0 %v3066_v61  ;;  %2429 = vmatpush.msrb.mxu1 %v3094_v49 }
 0x3f7   : > { %2263 = vmatmul.f32.vlgmr.msrb.gmra.mxu2 %v2209_v4 }
 0x3f8   : > { %2455 = vmatpush.msrb.mxu2 %v3106_v57 }
 0x3f9   : > { %2287 = vmatmul.f32.vlgmr.msrb.gmra.mxu3 %v2210_v9 }
 0x3fa   : > { %2477 = vmatpush.msrb.mxu3 %v3094_v49 }
 0x3fd   : > { %2213 = vmatmul.f32.vlgmr.msrb.gmra.mxu0 %v2212_v42  ;;  %2333 = vmatmul.f32.vlgmr.msra.gmra.mxu1 %v2208_v28 }
 0x3fe   : > { %2406 = vmatpush.msrb.mxu0 %v3101_v53 }
 0x3ff   : > { %2359 = vmatmul.f32.vlgmr.msra.gmra.mxu2 %v2212_v42 }
 0x401   : > { %2385 = vmatmul.f32.vlgmr.msra.gmra.mxu3 %v2208_v28 }
 0x405   : > { %2311 = vmatmul.f32.vlgmr.msra.gmra.mxu0 %v2208_v28  ;;  %2433 = vmatmul.f32.vlgmr.msrb.gmra.mxu1 %v2210_v9 }
 0x407   : > { %2457 = vmatmul.f32.vlgmr.msrb.gmra.mxu2 %v2208_v28 }
 0x409   : > { %2479 = vmatmul.f32.vlgmr.msrb.gmra.mxu3 %v2208_v28 }
 0x40d   : > { %2409 = vmatmul.f32.vlgmr.msrb.gmra.mxu0 %v2209_v4 }
 0x45a   : > { %v1945_v61 = vpop.f32.mrf.mxu1 }
 0x462   : > { %v1919_v11 = vpop.f32.mrf.mxu0  ;;  %v1969_v62 = vpop.f32.mrf.mxu2 }
 0x463   : > { %v1946_v57 = vadd.f32 %v1945_v61, %v1919_v11  ;;  %v2039_v10 = vpop.f32.mrf.mxu1 }
 0x464   : > { %v1993_v17 = vpop.f32.mrf.mxu3 }
 0x465   : > { %v1970_v49 = vadd.f32 %v1969_v62, %v1946_v57 }
 0x467   : > { %v1994_v21 = vadd.f32 %v1993_v17, %v1970_v49 }
 0x46a   : > { %v2017_v32 = vpop.f32.mrf.mxu0  ;;  %v2065_v34 = vpop.f32.mrf.mxu2 }
 0x46b   : > { %v2018_v35 = vadd.f32 %v2017_v32, %v1994_v21  ;;  %v2139_v46 = vpop.f32.mrf.mxu1 }
 0x46c   : > { %v2091_v53 = vpop.f32.mrf.mxu3 }
 0x46d   : > { %v2040_v44 = vadd.f32 %v2039_v10, %v2018_v35  ;;  %v2092_v20 = vadd.f32 %v2091_v53, %v2065_v34 }
 0x46f   : > { %2483 = vst [vmem:[%s3189_s9] sm:$0xff] %v2040_v44 }
 0x472   : > { %v2115_v51 = vpop.f32.mrf.mxu0  ;;  %v2163_v54 = vpop.f32.mrf.mxu2 }
 0x473   : > { %v2116_v58 = vadd.f32 %v2115_v51, %v2092_v20  ;;  %v2240_v2 = vpop.f32.mrf.mxu1 }
 0x474   : > { %v2185_v59 = vpop.f32.mrf.mxu3 }
 0x475   : > { %v2140_v60 = vadd.f32 %v2139_v46, %v2116_v58 }
 0x477   : > { %v2164_v63 = vadd.f32 %v2163_v54, %v2140_v60 }
 0x479   : > { %v2186_v7 = vadd.f32 %v2185_v59, %v2164_v63 }
 0x47a   : > { %v2214_v29 = vpop.f32.mrf.mxu0  ;;  %v2264_v30 = vpop.f32.mrf.mxu2 }
 0x47b   : > { %2484 = vst [vmem:[%s3189_s9 + $0x8] sm:$0xff] %v2186_v7  ;;  %v2241_v33 = vadd.f32 %v2240_v2, %v2214_v29  ;;  %v2334_v39 = vpop.f32.mrf.mxu1 }
 0x47c   : > { %v2288_v36 = vpop.f32.mrf.mxu3 }
 0x47d   : > { %v2265_v37 = vadd.f32 %v2264_v30, %v2241_v33 }
 0x47f   : > { %v2289_v38 = vadd.f32 %v2288_v36, %v2265_v37 }
 0x482   : > { %v2312_v13 = vpop.f32.mrf.mxu0  ;;  %v2360_v41 = vpop.f32.mrf.mxu2 }
 0x483   : > { %v2313_v31 = vadd.f32 %v2312_v13, %v2289_v38  ;;  %v2434_v47 = vpop.f32.mrf.mxu1 }
 0x484   : > { %v2386_v14 = vpop.f32.mrf.mxu3 }
 0x485   : > { %v2335_v40 = vadd.f32 %v2334_v39, %v2313_v31  ;;  %v2387_v22 = vadd.f32 %v2386_v14, %v2360_v41 }
 0x487   : > { %2485 = vst [vmem:[%s3189_s9 + $0x10] sm:$0xff] %v2335_v40 }
 0x48a   : > { %v2410_v43 = vpop.f32.mrf.mxu0  ;;  %v2458_v52 = vpop.f32.mrf.mxu2 }
 0x48b   : > { %v2411_v6 = vadd.f32 %v2410_v43, %v2387_v22 }
 0x48c   : > { %v2480_v0 = vpop.f32.mrf.mxu3 }
 0x48d   : > { %v2435_v48 = vadd.f32 %v2434_v47, %v2411_v6 }
 0x48f   : > { %v2459_v55 = vadd.f32 %v2458_v52, %v2435_v48 }
 0x491   : > { %v2481_v1 = vadd.f32 %v2480_v0, %v2459_v55 }
 0x493   : > { %2486 = vst [vmem:[%s3189_s9 + $0x18] sm:$0xff] %v2481_v1 }
 0x494 PF: > { %s17_s21 = sadd.s32 1, %s2632_s21  }
 0x495   : > { %p14_p4 = scmp.ge.s32.totalorder %s17_s21, 4  }
 0x497   :  { %16 = sbr.rel (!%p14_p4) target bundleno = 1 (0x1), region = 85 }

</bundles_post_ra>
